<compile_context>
chip_gen: v7x
topology: tpu7x:2x2x1
jax: 0.10.0
libtpu: 0.0.40
codegen_flags: <defaults>
</compile_context>

<pallas_src>
import numpy as np
import jax
import jax.numpy as jnp
from jax.experimental import pallas as pl
from jax.experimental.pallas import tpu as pltpu


def _sinusoid_table_ct(num_hidden_last, input_length, dtype=jnp.float32):
    """Compact sinusoid table, shape (C, T).

    Same values as PositionalEncoding._get_sinusoid_encoding_table(); that
    torch buffer is simply this table broadcast over (batch, H, W)."""
    C, T = num_hidden_last, input_length
    hid = np.arange(C)
    pos = np.arange(T)
    denom = np.power(10000.0, 2 * (hid // 2) / C)                 # (C,)
    angle = pos[None, :] / denom[:, None]                         # (C, T)
    table = np.where((hid % 2 == 0)[:, None], np.sin(angle), np.cos(angle))
    return jnp.asarray(table, dtype=dtype)


def _tile_pe_flat(pe_ct, H, W):
    """(C, T) -> (C, H*W*T): lane-dense slab matching a flattened (B, C, H*W*T) x."""
    C, T = pe_ct.shape
    return jnp.tile(pe_ct[:, None, :], (1, H * W, 1)).reshape(C, H * W * T)


def _pick_lane_chunk(L, C, itemsize, batch, target_bytes=2 * 1024 * 1024):
    """Largest lane chunk (multiple of 128 dividing L) with a block of ~target_bytes."""
    if L % 128 != 0:
        return L                       # full-extent last dim is always a legal block
    bytes_per_unit = C * 128 * max(int(itemsize), 4)   # pe block is f32
    max_units = max(1, target_bytes // bytes_per_unit)
    units = L // 128
    best = 1
    for d in range(1, units + 1):
        if units % d == 0 and d <= max_units:
            best = d
    # give the v7x megacore >= 2 grid steps when there is no batch parallelism
    if batch == 1 and best == units and units % 2 == 0:
        best = units // 2
    return best * 128


def _add_pe_kernel(x_ref, pe_ref, o_ref):
    # x tile: (1, C, Lc); pe tile: (C, Lc) f32 (stays VMEM-resident across the
    # inner batch axis because its block index does not change there).
    # Add in f32, cast on store (matches adding an f32 table to x).
    o_ref[...] = (x_ref[...].astype(jnp.float32) + pe_ref[...]).astype(o_ref.dtype)


def add_positional_encoding(x, pe_flat):
    """x: (B, C, H, W, T); pe_flat: (C, H*W*T). Returns x + pe (broadcast over B, H, W)."""
    B, C, H, W, T = x.shape
    L = H * W * T
    assert pe_flat.shape == (C, L)
    x3 = x.reshape(B, C, L)                      # row-major collapse; no copy
    pe_f32 = pe_flat.astype(jnp.float32)

    Lc = _pick_lane_chunk(L, C, x.dtype.itemsize, B)
    num_l = L // Lc

    out = pl.pallas_call(
        _add_pe_kernel,
        out_shape=jax.ShapeDtypeStruct((B, C, L), x.dtype),
        # Batch is the innermost grid axis, so the PE chunk's block index is
        # unchanged across it -> Pallas skips the re-DMA and the whole table is
        # streamed from HBM exactly once (instead of B*H*W-times-broadcast).
        grid=(num_l, B),
        in_specs=[pl.BlockSpec((1, C, Lc), lambda l, b: (b, 0, l)),
                  pl.BlockSpec((C, Lc), lambda l, b: (0, l))],
        out_specs=pl.BlockSpec((1, C, Lc), lambda l, b: (b, 0, l)),
        input_output_aliases={0: 0},             # in-place add: no extra HBM buffer
        compiler_params=pltpu.CompilerParams(
            dimension_semantics=("parallel", "parallel"),
            vmem_limit_bytes=32 * 1024 * 1024),
    )(x3, pe_f32)
    return out.reshape(B, C, H, W, T)


class PositionalEncoding:
    """JAX/Pallas port of the PyTorch PositionalEncoding module."""

    def __init__(self, num_hidden, batch_size, img_width, img_height, input_length):
        self.num_hidden = num_hidden
        self.batch_size = batch_size
        self.img_width = img_width
        self.img_height = img_height
        self.input_length = input_length
        C = num_hidden[-1]
        self._C = C
        # Compact (C, T) table; the torch buffer is this broadcast to (B, C, H, W, T).
        self.pe_ct = _sinusoid_table_ct(C, input_length)
        # Pre-tiled lane-dense slab for the matching-shape fast path (~32 KiB here).
        self._pe_flat = _tile_pe_flat(self.pe_ct, img_height, img_width)
        self._table_shape = (batch_size, C, img_height, img_width, input_length)
        self._resize_cache = {}

    @property
    def pos_table(self):
        """Full-shape buffer for parity/inspection only (not used in the hot path)."""
        return jnp.broadcast_to(self.pe_ct[None, :, None, None, :], self._table_shape)

    def _resized_pe_flat(self, Hn, Wn):
        # Torch path: squeeze -> permute -> F.interpolate(nearest, (Hn, Wn)) ->
        # permute back -> unsqueeze -> broadcast add.  The table is spatially
        # constant, so nearest-neighbor resize is the identity on values; only
        # the spatial extent changes.  Cache the re-tiled slab per (Hn, Wn).
        key = (Hn, Wn)
        if key not in self._resize_cache:
            self._resize_cache[key] = _tile_pe_flat(self.pe_ct, Hn, Wn)
        return self._resize_cache[key]

    def __call__(self, x):
        B, C, H, W, T = x.shape
        assert C == self._C and T == self.input_length
        if x.shape != self._table_shape:
            # Mismatched-shape branch: spatially-resized PE, broadcast over batch
            # (superset of the torch path, which additionally assumes table batch == 1).
            pe_flat = self._resized_pe_flat(H, W)
        else:
            pe_flat = self._pe_flat
        return add_positional_encoding(x, pe_flat)


if __name__ == "__main__":
    key = jax.random.PRNGKey(0)
    B, C, H, W, T = 2, 4, 16, 16, 8
    num_hidden = [32, C]  # only num_hidden[-1] is used by the module

    x = jax.random.normal(key, (B, C, H, W, T), dtype=jnp.float32)

    module = PositionalEncoding(num_hidden, batch_size=B, img_width=W,
                                img_height=H, input_length=T)
    out = jax.block_until_ready(module(x))

    # reference check (matching-shape path: x + broadcast pos table)
    ref = x + module.pe_ct[None, :, None, None, :]
    assert out.shape == x.shape
    assert jnp.allclose(out, ref, atol=1e-6), "matching-shape path mismatch"

    # mismatched-shape (resize) branch
    x2 = jax.random.normal(jax.random.PRNGKey(1), (1, C, 8, 8, T), dtype=jnp.float32)
    out2 = jax.block_until_ready(module(x2))
    ref2 = x2 + module.pe_ct[None, :, None, None, :]
    assert out2.shape == x2.shape
    assert jnp.allclose(out2, ref2, atol=1e-6), "resize path mismatch"

    print("KERNEL_OK")
</pallas_src>

<mosaic_0001>
module attributes {stable_mosaic.version = 11 : i64} {
  func.func @_add_pe_kernel(%arg0: i32, %arg1: i32, %arg2: memref<1x4x2048xf32, #tpu.memory_space<vmem>>, %arg3: memref<4x2048xf32, #tpu.memory_space<vmem>>, %arg4: memref<1x4x2048xf32, #tpu.memory_space<vmem>>) attributes {dimension_semantics = [#tpu.dimension_semantics<parallel>, #tpu.dimension_semantics<parallel>], iteration_bounds = array<i64: 1, 2>, scalar_prefetch = 0 : i64, scratch_operands = 0 : i64, tpu.core_type = #tpu.core_type<tc>, window_params = [{transform_indices = @transform_0, window_bounds = array<i64: 1, 4, 2048>}, {transform_indices = @transform_1, window_bounds = array<i64: 4, 2048>}, {transform_indices = @transform_2, window_bounds = array<i64: 1, 4, 2048>}]} {
    %c0 = arith.constant 0 : index
    %c0_0 = arith.constant 0 : index
    %c0_1 = arith.constant 0 : index
    %0 = vector.load %arg2[%c0, %c0_0, %c0_1] : memref<1x4x2048xf32, #tpu.memory_space<vmem>>, vector<1x4x2048xf32>
    %c0_2 = arith.constant 0 : index
    %c0_3 = arith.constant 0 : index
    %1 = vector.load %arg3[%c0_2, %c0_3] : memref<4x2048xf32, #tpu.memory_space<vmem>>, vector<4x2048xf32>
    %2 = vector.shape_cast %1 : vector<4x2048xf32> to vector<1x4x2048xf32>
    %3 = arith.addf %0, %2 : vector<1x4x2048xf32>
    %c0_4 = arith.constant 0 : index
    %c0_5 = arith.constant 0 : index
    %c0_6 = arith.constant 0 : index
    %4 = vector.load %arg4[%c0_4, %c0_5, %c0_6] : memref<1x4x2048xf32, #tpu.memory_space<vmem>>, vector<1x4x2048xf32>
    tpu.vector_store %arg4[%c0_4, %c0_5, %c0_6], %3 {strides = array<i32>} : memref<1x4x2048xf32, #tpu.memory_space<vmem>>, vector<1x4x2048xf32>,
    return
  }
  func.func @transform_0(%arg0: i32, %arg1: i32) -> (i32, i32, i32) {
    %c0_i32 = arith.constant 0 : i32
    %c0_i32_0 = arith.constant 0 : i32
    return %arg1, %c0_i32, %arg0 : i32, i32, i32
  }
  func.func @transform_1(%arg0: i32, %arg1: i32) -> (i32, i32) {
    %c0_i32 = arith.constant 0 : i32
    %c0_i32_0 = arith.constant 0 : i32
    return %c0_i32, %arg0 : i32, i32
  }
  func.func @transform_2(%arg0: i32, %arg1: i32) -> (i32, i32, i32) {
    %c0_i32 = arith.constant 0 : i32
    %c0_i32_0 = arith.constant 0 : i32
    return %arg1, %c0_i32, %arg0 : i32, i32, i32
  }
}

</mosaic_0001>

<bundles_post_ra>
// kernel: tpu_custom_call.1
= control target key start
LH: loop header
LB: loop body
LE: loop exit
PB: predicated region body
PF: predicated region fallthrough
CT: control target
= control target key end

     0   :  { %7 = vsyncpa [#allocation3], 0  ;;  %s757_s0 = inlined_call_operand.hbm [shape: f32[2,4,2048], index: 0, kind: input, shape index: {}, may-alias: {0,2}]   ;;  %s758_s1 = inlined_call_operand.vmem [shape: f32[4,2048], index: 1, kind: input, shape index: {}]   ;;  %s759_s2 = inlined_call_operand.hbm [shape: f32[2,4,2048], index: 2, kind: output, shape index: {}, may-alias: {0,2}]  }
   0x1   :  { %9 = vsyncpa [#allocation3 + $0x1], 0 }
   0x2   :  { %10 = vsyncpa [#allocation4], 0 }
   0x3   :  { %12 = vsyncpa [#allocation4 + $0x1], 0  ;;  %s561_s9 = smov 0   ;;  %s563_s10 = smov 0  }
   0x4   :  { %s565_s11 = smov 0   ;;  %s567_s12 = smov 0  }
   0x5   :  { %s569_s13 = smov 0   ;;  %s571_s14 = smov 0  }
   0x6 LB: > { %s350_s15 = sadd.s32 4294967295, %s542_s14   ;;  %s351_s16 = sadd.s32 4294967294, %s542_s14   ;;  %s542_s14 = sphi %s571_s14, %s18_s14   ;;  %s538_s13 = sphi %s569_s13, %s775_s13   ;;  %s534_s12 = sphi %s567_s12, %s774_s12   ;;  %s530_s11 = sphi %s565_s11, %s773_s11   ;;  %s526_s10 = sphi %s563_s10, %s772_s10   ;;  %s522_s9 = sphi %s561_s9, %s771_s9  }
   0x7   : > { %s27_s17 = sadd.s32 1, %s538_s13  ;;  %s39_s18 = sadd.s32 1, %s530_s11 }
   0x8   : > { %p28_p0 = scmp.ge.s32.totalorder %s27_s17, 2  ;;  %p46_p1 = scmp.ne.s32.totalorder %s530_s11, %s526_s10 }
   0x9   : > { %p47_p2 = scmp.eq.s32.totalorder %s542_s14, 0  ;;  %p52_p3 = scmp.ne.s32.totalorder %s526_s10, %s522_s9 }
   0xa   : > { %s777_s17 = smov (%p28_p0, %s27_s17), 0  ;;  %p53_p5 = scmp.eq.s32.totalorder %s350_s15, 0 }
   0xb   : > { %p602_p4 = por %p47_p2, %p46_p1  ;;  %s34_s20 = ssub.s32 %s538_s13, %s777_s17 }
   0xc   : > { %p104_p6 = scmp.eq.s32.totalorder %s350_s15, 1  ;;  %p37_p7 = scmp.eq.s32.totalorder %s34_s20, 0 }
   0xd   : > { %p608_p8 = por %p53_p5, %p52_p3  ;;  %p110_p10 = scmp.eq.s32.totalorder %s351_s16, 1 }
   0xe   : > { %p612_p9 = por %p104_p6, %p46_p1  ;;  %p380_p13 = scmp.lt.s32.totalorder %s542_s14, 2 }
   0xf   : > { %s617_s23 = scalar_select %p37_p7, %s530_s11, %s39_s18  }
  0x10   : > { %s763_s22 = scalar_select %p612_p9, 1, 0 }
  0x11   : > { %p619_p11 = por %p110_p10, %p52_p3  ;;  %s139_s25 = sand.u32 1, %s530_s11  }
  0x12   : > { %s355_s26 = sshll.u32 %s139_s25, 6  ;;  %s366_s27 = sshll.u32 %s538_s13, 10 }
  0x13   : > { %s764_s24 = scalar_select %p619_p11, 1, 0 }
  0x14   : > { %s630_s30 = scalar_lea.hbm %s757_s0, %s366_s27  ;;  %s143_s3 = scalar_lea.vmem [#allocation2], %s355_s26 }
  0x15   : > { %s153_s4 = sshll.u32 %s143_s3, 4  ;;  %p636_p0 = pnand %p380_p13, %p602_p4  ;;  %s632_s4 = int_to_ptr.vmem [resolvable:$true] %s153_s4 }
  0x16   : > { %s140_s6 = scalar_lea.sflag [#allocation3], %s139_s25  ;;  %s430_s7 = scalar_lea.hbm %s630_s30, 1024 }
  0x17   : > { %p431_p3 = scmp.ne.s32.totalorder %s630_s30, %s430_s7  ;;  %p432_p5 = pneg %p636_p0 }
  0x18   : > { %s435_s16 = scalar_lea.hbm %s757_s0, 2048  ;;  %p436_p4 = scmp.lt.u32.totalorder %s630_s30, %s757_s0 }
  0x19   : > { %p433_p6 = pnand %p432_p5, %p431_p3  ;;  %p437_p10 = scmp.lt.u32.totalorder %s435_s16, %s430_s7 }
  0x1a   : > { %p439_p12 = scmp.lt.u32.totalorder %s430_s7, %s630_s30 }
  0x1b   : > { %p434_p7 = pneg %p433_p6  ;;  %p438_p13 = por %p437_p10, %p436_p4 }
  0x1d   : > { %p440_p1 = por %p439_p12, %p438_p13 }
  0x1f   : > { %p441_p2 = pnand %p440_p1, %p434_p7 }
  0x21   : > { %444 = shalt.err (!%p441_p2)
}
  0x22   : > { %s445_s20 = scalar_lea.vmem %s632_s4, 1024  ;;  %s544_s25 = smov [#allocation2]  }
  0x23   : > { %p446_p3 = scmp.ne.s32.totalorder %s632_s4, %s445_s20  ;;  %s450_s26 = sshll.u32 %s544_s25, 4  ;;  %s451_s26 = int_to_ptr.vmem [resolvable:$false] %s450_s26 }
  0x24   : > { %s452_s27 = scalar_lea.vmem %s451_s26, 2048  ;;  %p453_p9 = scmp.lt.s32.totalorder %s632_s4, %s451_s26 }
  0x25   : > { %p448_p6 = pnand %p446_p3, %p432_p5  ;;  %p454_p4 = scmp.lt.s32.totalorder %s452_s27, %s445_s20 }
  0x27   : > { %p449_p11 = pneg %p448_p6  ;;  %p455_p10 = por %p454_p4, %p453_p9 }
  0x29   : > { %p456_p12 = pnand %p455_p10, %p449_p11 }
  0x2b   : > { %459 = shalt.err (!%p456_p12)
}
  0x2c   : > { %375 = dma.hbm_to_vmem [thread:$0]  (!%p636_p0), %s630_s30, 1024, %s632_s4, %s140_s6  }
  0x2d   : > { %p766_p1 = scmp.lt.s32.totalorder %s542_s14, 3  ;;  %p767_p2 = scmp.ge.s32.totalorder %s542_s14, 1 }
  0x2f   : > { %p159_p5 = pnand %p767_p2, %p766_p1 }
  0x30   : > { %s672_s28 = sand.u32 (!%p159_p5), 1, %s526_s10  }
  0x31   : > { %162 = sbr.rel (%p159_p5) target bundleno = 83 (0x53), region = 28  ;;  %s359_s29 = sshll.u32 (!%p159_p5), %s672_s28, 6 }
  0x32   : > { %s165_s3 = scalar_lea.sflag (!%p159_p5), [#allocation3], %s672_s28  ;;  %s168_s7 = scalar_lea.vmem (!%p159_p5), [#allocation2], %s359_s29 }
  0x38   : > { %513 = dma.done.wait (%p608_p8), %s165_s3, 1024  }
  0x39   : > { %515 = vsyncadd (%p608_p8), %s165_s3, 4294966272  ;;  %v202_v0 = vld [vmem:[%s168_s7] sm:$0xff]  ;;  %v203_v2 = vld [vmem:[%s168_s7 + $0x8] sm:$0xff]  ;;  %s193_s18 = scalar_lea.vmem [#allocation5], %s359_s29  ;;  %s367_s27 = sshll.u32 %s534_s12, 10 }
  0x3a   : > { %v210_v1 = vld [vmem:[%s758_s1] sm:$0xff]  ;;  %v211_v4 = vld [vmem:[%s758_s1 + $0x8] sm:$0xff]  ;;  %v204_v5 = vld [vmem:[%s168_s7 + $0x10] sm:$0xff]  ;;  %s251_s3 = sshll.u32 %s193_s18, 4  ;;  %s708_s8 = scalar_lea.hbm %s759_s2, %s367_s27  ;;  %s710_s3 = int_to_ptr.vmem [resolvable:$true] %s251_s3 }
  0x3b   : > { %v218_v3 = vadd.f32 %v210_v1, %v202_v0  ;;  %v212_v6 = vld [vmem:[%s758_s1 + $0x10] sm:$0xff]  ;;  %v219_v7 = vadd.f32 %v211_v4, %v203_v2  ;;  %v205_v9 = vld [vmem:[%s168_s7 + $0x18] sm:$0xff]  ;;  %v206_v11 = vld [vmem:[%s168_s7 + $0x20] sm:$0xff]  ;;  %s460_s15 = scalar_lea.vmem %s710_s3, 1024  ;;  %p768_p9 = scmp.ne.s32.totalorder %s763_s22, 0 }
  0x3c   : > { %v220_v8 = vadd.f32 %v212_v6, %v204_v5  ;;  %v213_v10 = vld [vmem:[%s758_s1 + $0x18] sm:$0xff]  ;;  %v214_v13 = vld [vmem:[%s758_s1 + $0x20] sm:$0xff]  ;;  %v207_v14 = vld [vmem:[%s168_s7 + $0x28] sm:$0xff]  ;;  %p461_p8 = scmp.ne.s32.totalorder %s710_s3, %s460_s15  ;;  %s545_s21 = smov [#allocation5]  }
  0x3d   : > { %226 = vst [vmem:[%s193_s18] sm:$0xff] %v218_v3  ;;  %v221_v12 = vadd.f32 %v213_v10, %v205_v9  ;;  %v215_v15 = vld [vmem:[%s758_s1 + $0x28] sm:$0xff]  ;;  %227 = vst [vmem:[%s193_s18 + $0x8] sm:$0xff] %v219_v7  ;;  %v222_v16 = vadd.f32 %v214_v13, %v206_v11  ;;  %v208_v18 = vld [vmem:[%s168_s7 + $0x30] sm:$0xff]  ;;  %s464_s16 = sshll.u32 %s545_s21, 4  ;;  %s465_s16 = int_to_ptr.vmem [resolvable:$false] %s464_s16 }
  0x3e   : > { %228 = vst [vmem:[%s193_s18 + $0x10] sm:$0xff] %v220_v8  ;;  %v223_v17 = vadd.f32 %v215_v15, %v207_v14  ;;  %v216_v19 = vld [vmem:[%s758_s1 + $0x30] sm:$0xff]  ;;  %v209_v20 = vld [vmem:[%s168_s7 + $0x38] sm:$0xff]  ;;  %s235_s7 = scalar_lea.sflag [#allocation4], %s672_s28  ;;  %p462_p11 = pnand %p461_p8, %p768_p9 }
  0x3f   : > { %229 = vst [vmem:[%s193_s18 + $0x18] sm:$0xff] %v221_v12  ;;  %v224_v21 = vadd.f32 %v216_v19, %v208_v18  ;;  %v217_v22 = vld [vmem:[%s758_s1 + $0x38] sm:$0xff]  ;;  %230 = vst [vmem:[%s193_s18 + $0x20] sm:$0xff] %v222_v16  ;;  %s466_s19 = scalar_lea.vmem %s465_s16, 2048  ;;  %p467_p7 = scmp.lt.s32.totalorder %s710_s3, %s465_s16 }
  0x40   : > { %231 = vst [vmem:[%s193_s18 + $0x28] sm:$0xff] %v223_v17  ;;  %v225_v23 = vadd.f32 %v217_v22, %v209_v20  ;;  %p463_p0 = pneg %p462_p11  ;;  %p468_p13 = scmp.lt.s32.totalorder %s466_s19, %s460_s15 }
  0x41   : > { %232 = vst [vmem:[%s193_s18 + $0x30] sm:$0xff] %v224_v21 }
  0x42   : > { %233 = vst [vmem:[%s193_s18 + $0x38] sm:$0xff] %v225_v23  ;;  %p469_p3 = por %p468_p13, %p467_p7 }
  0x44   : > { %p470_p6 = pnand %p469_p3, %p463_p0 }
  0x46   : > { %473 = shalt.err (!%p470_p6)
}
  0x47   : > { %s474_s28 = scalar_lea.hbm %s708_s8, 1024  ;;  %s478_s25 = scalar_lea.hbm %s759_s2, 2048 }
  0x48   : > { %p475_p4 = scmp.ne.s32.totalorder %s708_s8, %s474_s28  ;;  %p479_p1 = scmp.lt.u32.totalorder %s708_s8, %s759_s2 }
  0x49   : > { %p480_p2 = scmp.lt.u32.totalorder %s478_s25, %s474_s28  ;;  %p482_p8 = scmp.lt.u32.totalorder %s474_s28, %s708_s8 }
  0x4a   : > { %p476_p10 = pnand %p475_p4, %p768_p9 }
  0x4b   : > { %p481_p5 = por %p480_p2, %p479_p1 }
  0x4c   : > { %p477_p12 = pneg %p476_p10 }
  0x4d   : > { %p483_p11 = por %p482_p8, %p481_p5 }
  0x4f   : > { %p484_p0 = pnand %p483_p11, %p477_p12 }
  0x51   : > { %487 = shalt.err (!%p484_p0)
}
  0x52   : > { %370 = dma.vmem_to_hbm [thread:$0]  (%p768_p9), %s710_s3, 1024, %s708_s8, %s235_s7  }
  0x53 PF: > { %s263_s29 = sand.u32 1, %s522_s9   ;;  %p769_p7 = scmp.ne.s32.totalorder %s764_s24, 0 }
  0x54   : > { %p770_p13 = scmp.ge.s32.totalorder %s542_s14, 2  ;;  %s264_s30 = scalar_lea.sflag [#allocation4], %s263_s29 }
  0x56   : > { %p377_p3 = pnand %p770_p13, %p769_p7 }
  0x58   : > { %517 = dma.done.wait (!%p377_p3), %s264_s30, 1024  }
  0x59   : > { %519 = vsyncadd (!%p377_p3), %s264_s30, 4294966272  ;;  %s18_s14 = sadd.s32 1, %s542_s14   ;;  %s771_s9 = smov %s526_s10 }
  0x5a   : > { %p15_p6 = scmp.ge.s32.totalorder %s18_s14, 4   ;;  %s772_s10 = smov %s530_s11 }
  0x5b   : > { %s773_s11 = smov %s617_s23  ;;  %s774_s12 = smov %s538_s13 }
  0x5c   : > { %s775_s13 = smov %s777_s17  ;;  %17 = sbr.rel (!%p15_p6) target bundleno = 6 (0x6), region = 76 }
  0x63   :  { %269 = vsyncpa [#allocation3], 1 }
  0x64   :  { %271 = vsyncpa [#allocation3 + $0x1], 1 }
  0x65   :  { %272 = vsyncpa [#allocation4], 1 }
  0x66   :  { %274 = vsyncpa [#allocation4 + $0x1], 1 }

</bundles_post_ra>
